<compile_context>
chip_gen: v7x
topology: tpu7x:2x2x1
jax: 0.10.0
libtpu: 0.0.40
codegen_flags: <defaults>
</compile_context>

<pallas_src>
import functools
import math

import jax
import jax.numpy as jnp
from jax.experimental import pallas as pl
from jax.experimental.pallas import tpu as pltpu

BN_EPS = 1e-3
NUM_BLOCK35 = 10   # timm repeat counts
NUM_BLOCK17 = 20
NUM_BLOCK8 = 9     # plus one final no-relu Block8

MM_TILE_M = 256                      # row tile for all matmul-style kernels
VMEM_LIMIT = 24 * 1024 * 1024        # conservative for v7x (64 MiB VMEM/TC)


def _ru(x, m):
    return (x + m - 1) // m * m


def _cdiv(a, b):
    return (a + b - 1) // b


def _cparams(n_grid_axes):
    return pltpu.CompilerParams(
        dimension_semantics=("parallel",) * n_grid_axes,
        vmem_limit_bytes=VMEM_LIMIT)


# --------------------------- Pallas kernels ---------------------------------

def _mm_bias_act_kernel(a_ref, w_ref, b_ref, o_ref, *, relu):
    acc = jnp.dot(a_ref[...], w_ref[...], preferred_element_type=jnp.float32)
    acc = acc + b_ref[...].astype(jnp.float32)
    if relu:
        acc = jnp.maximum(acc, 0.0)
    o_ref[...] = acc.astype(o_ref.dtype)


def _shift_conv_kernel(x_ref, w_ref, b_ref, o_ref, *, kh, kw, cin, wp, relu):
    # x_ref: (R, Cin) flattened padded image; o_ref: (TM, Cout) tile of the
    # "padded-width" flat output; accumulate kh*kw shifted matmuls.
    tm, cout = o_ref.shape
    base = pl.program_id(1) * tm
    acc = jnp.zeros((tm, cout), jnp.float32)
    for dy in range(kh):
        for dx in range(kw):
            t = dy * kw + dx
            a = x_ref[pl.ds(base + dy * wp + dx, tm), :]
            w = w_ref[t * cin:(t + 1) * cin, :]
            acc = acc + jnp.dot(a, w, preferred_element_type=jnp.float32)
    acc = acc + b_ref[...].astype(jnp.float32)
    if relu:
        acc = jnp.maximum(acc, 0.0)
    o_ref[...] = acc.astype(o_ref.dtype)


def _fused_res_kernel(*refs, bc, scale, relu):
    # refs: x, branch_0..branch_{nb-1}, w (sum(bc), Cx), bias (1, Cx), out
    nb = len(bc)
    x_ref = refs[0]
    br_refs = refs[1:1 + nb]
    w_ref = refs[1 + nb]
    b_ref = refs[2 + nb]
    o_ref = refs[-1]
    acc = None
    off = 0
    for i, c in enumerate(bc):
        d = jnp.dot(br_refs[i][...], w_ref[off:off + c, :],
                    preferred_element_type=jnp.float32)
        acc = d if acc is None else acc + d
        off += c
    acc = acc + b_ref[...].astype(jnp.float32)
    out = x_ref[...].astype(jnp.float32) + scale * acc
    if relu:
        out = jnp.maximum(out, 0.0)
    o_ref[...] = out.astype(o_ref.dtype)


def _max_reduce_kernel(p_ref, o_ref):
    taps = p_ref.shape[0]
    acc = p_ref[0]
    for k in range(1, taps):
        acc = jnp.maximum(acc, p_ref[k])
    o_ref[...] = acc


def _avg_reduce_kernel(p_ref, r_ref, o_ref):
    taps = p_ref.shape[0]
    acc = p_ref[0].astype(jnp.float32)
    for k in range(1, taps):
        acc = acc + p_ref[k].astype(jnp.float32)
    o_ref[...] = (acc * r_ref[...]).astype(o_ref.dtype)


# --------------------------- kernel wrappers ---------------------------------

def _matmul_bias_act(a, w, b, relu, out_dtype):
    """out = act(a @ w + b); a:(M,K) w:(K,N) b:(N,). Row-tiled grid, bf16 MXU."""
    M, K = a.shape
    _, N = w.shape
    tm = min(MM_TILE_M, _ru(M, 8))
    nt = _cdiv(M, tm)
    return pl.pallas_call(
        functools.partial(_mm_bias_act_kernel, relu=relu),
        grid=(nt,),
        out_shape=jax.ShapeDtypeStruct((M, N), out_dtype),
        in_specs=[pl.BlockSpec((tm, K), lambda i: (i, 0)),
                  pl.BlockSpec((K, N), lambda i: (0, 0)),
                  pl.BlockSpec((1, N), lambda i: (0, 0))],
        out_specs=pl.BlockSpec((tm, N), lambda i: (i, 0)),
        compiler_params=_cparams(1),
    )(a, w, b.reshape(1, N))


@functools.partial(jax.jit, static_argnames=('relu',))
def conv1x1(x, w, b, *, relu):
    """1x1 conv: pure reshape + tiled matmul (no im2col)."""
    N, H, W, C = x.shape
    cout = w.shape[-1]
    out = _matmul_bias_act(x.reshape(N * H * W, C), w.reshape(C, cout), b,
                           relu, jnp.bfloat16)
    return out.reshape(N, H, W, cout)


@functools.partial(jax.jit, static_argnames=('pad', 'relu'))
def conv_spatial_s1(x, w, b, *, pad, relu):
    """Stride-1 spatial conv via in-VMEM shift-accumulate (kn2row)."""
    N, H, W, C = x.shape
    kh, kw, _, cout = w.shape
    ph, pw = pad
    Hp, Wp = H + 2 * ph, W + 2 * pw
    Ho, Wo = Hp - kh + 1, Wp - kw + 1
    G = Ho * Wp                              # flat output length (padded width)
    tm = min(MM_TILE_M, _ru(G, 8))
    nt = _cdiv(G, tm)
    off_max = (kh - 1) * Wp + (kw - 1)
    r_needed = nt * tm + off_max             # rows the kernel may touch
    extra_h = _cdiv(max(0, r_needed - Hp * Wp), Wp)
    xp = jnp.pad(x, ((0, 0), (ph, ph + extra_h), (pw, pw), (0, 0)))
    R = (Hp + extra_h) * Wp
    xf = xp.reshape(N, R, C)
    out = pl.pallas_call(
        functools.partial(_shift_conv_kernel, kh=kh, kw=kw, cin=C, wp=Wp,
                          relu=relu),
        grid=(N, nt),
        out_shape=jax.ShapeDtypeStruct((N, G, cout), jnp.bfloat16),
        in_specs=[pl.BlockSpec((None, R, C), lambda n, m: (n, 0, 0)),
                  pl.BlockSpec((kh * kw * C, cout), lambda n, m: (0, 0)),
                  pl.BlockSpec((1, cout), lambda n, m: (0, 0))],
        out_specs=pl.BlockSpec((None, tm, cout), lambda n, m: (n, m, 0)),
        compiler_params=_cparams(2),
    )(xf, w.reshape(kh * kw * C, cout), b.reshape(1, cout))
    return out.reshape(N, Ho, Wp, cout)[:, :, :Wo, :]


def _im2col_nhwc(x, kh, kw, stride):
    N, H, W, C = x.shape
    Ho = (H - kh) // stride + 1
    Wo = (W - kw) // stride + 1
    cols = []
    for i in range(kh):
        for j in range(kw):
            cols.append(x[:, i:i + stride * (Ho - 1) + 1:stride,
                          j:j + stride * (Wo - 1) + 1:stride, :])
    return jnp.stack(cols, axis=3), Ho, Wo   # (N, Ho, Wo, P, C)


@functools.partial(jax.jit, static_argnames=('stride', 'pad', 'relu'))
def conv_im2col(x, w, b, *, stride, pad, relu):
    """Fallback path for the few stride-2 convolutions."""
    if pad != (0, 0):
        x = jnp.pad(x, ((0, 0), (pad[0], pad[0]), (pad[1], pad[1]), (0, 0)))
    N, H, W, C = x.shape
    kh, kw, _, cout = w.shape
    patches, Ho, Wo = _im2col_nhwc(x, kh, kw, stride)
    a = patches.reshape(N * Ho * Wo, kh * kw * C)
    out = _matmul_bias_act(a, w.reshape(kh * kw * C, cout), b, relu,
                           jnp.bfloat16)
    return out.reshape(N, Ho, Wo, cout)


@functools.partial(jax.jit, static_argnames=('scale', 'relu'))
def fused_up_residual(x, w, b, *branches, scale, relu):
    """out = act(x + scale * (concat(branches) @ w + b)), single kernel."""
    N, H, W, Cx = x.shape
    M = N * H * W
    xf = x.reshape(M, Cx)
    brf = [t.reshape(M, t.shape[-1]) for t in branches]
    bc = tuple(int(t.shape[-1]) for t in branches)
    ctot = sum(bc)
    tm = min(MM_TILE_M, _ru(M, 8))
    nt = _cdiv(M, tm)
    in_specs = ([pl.BlockSpec((tm, Cx), lambda i: (i, 0))] +
                [pl.BlockSpec((tm, c), lambda i: (i, 0)) for c in bc] +
                [pl.BlockSpec((ctot, Cx), lambda i: (0, 0)),
                 pl.BlockSpec((1, Cx), lambda i: (0, 0))])
    out = pl.pallas_call(
        functools.partial(_fused_res_kernel, bc=bc, scale=scale, relu=relu),
        grid=(nt,),
        out_shape=jax.ShapeDtypeStruct((M, Cx), jnp.bfloat16),
        in_specs=in_specs,
        out_specs=pl.BlockSpec((tm, Cx), lambda i: (i, 0)),
        compiler_params=_cparams(1),
    )(xf, *brf, w, b.reshape(1, Cx))
    return out.reshape(N, H, W, Cx)


@functools.partial(jax.jit, static_argnames=('k', 'stride'))
def max_pool(x, *, k, stride):
    N, H, W, C = x.shape
    Ho = (H - k) // stride + 1
    Wo = (W - k) // stride + 1
    M = N * Ho * Wo
    cols = []
    for i in range(k):
        for j in range(k):
            cols.append(x[:, i:i + stride * (Ho - 1) + 1:stride,
                          j:j + stride * (Wo - 1) + 1:stride, :].reshape(M, C))
    p = jnp.stack(cols, axis=0)               # (P, M, C) -- taps on leading axis
    P = k * k
    tm = min(MM_TILE_M, _ru(M, 8))
    nt = _cdiv(M, tm)
    out = pl.pallas_call(
        _max_reduce_kernel,
        grid=(nt,),
        out_shape=jax.ShapeDtypeStruct((M, C), x.dtype),
        in_specs=[pl.BlockSpec((P, tm, C), lambda i: (0, i, 0))],
        out_specs=pl.BlockSpec((tm, C), lambda i: (i, 0)),
        compiler_params=_cparams(1),
    )(p)
    return out.reshape(N, Ho, Wo, C)


@jax.jit
def avg_pool_3x3_s1_p1(x):
    # count_include_pad=False (as in timm Mixed_5b branch3)
    N, H, W, C = x.shape
    M = N * H * W
    xp = jnp.pad(x, ((0, 0), (1, 1), (1, 1), (0, 0)))
    cols = []
    for i in range(3):
        for j in range(3):
            cols.append(xp[:, i:i + H, j:j + W, :].reshape(M, C))
    p = jnp.stack(cols, axis=0)               # (9, M, C)
    rv = (3.0 - (jnp.arange(H) == 0).astype(jnp.float32)
          - (jnp.arange(H) == H - 1).astype(jnp.float32))
    cv = (3.0 - (jnp.arange(W) == 0).astype(jnp.float32)
          - (jnp.arange(W) == W - 1).astype(jnp.float32))
    counts = rv[:, None] * cv[None, :]        # (H, W) valid-tap counts
    rcp = jnp.broadcast_to((1.0 / counts).reshape(1, H * W, 1),
                           (N, H * W, 1)).reshape(M, 1)
    tm = min(MM_TILE_M, _ru(M, 8))
    nt = _cdiv(M, tm)
    out = pl.pallas_call(
        _avg_reduce_kernel,
        grid=(nt,),
        out_shape=jax.ShapeDtypeStruct((M, C), x.dtype),
        in_specs=[pl.BlockSpec((9, tm, C), lambda i: (0, i, 0)),
                  pl.BlockSpec((tm, 1), lambda i: (i, 0))],
        out_specs=pl.BlockSpec((tm, C), lambda i: (i, 0)),
        compiler_params=_cparams(1),
    )(p, rcp)
    return out.reshape(N, H, W, C)


@jax.jit
def global_avg_pool(x):
    N, H, W, C = x.shape
    P = H * W
    p = x.reshape(N, P, C).transpose(1, 0, 2)   # (P, N, C)
    rcp = jnp.full((N, 1), 1.0 / P, jnp.float32)
    tm = _ru(N, 8)
    out = pl.pallas_call(
        _avg_reduce_kernel,
        grid=(1,),
        out_shape=jax.ShapeDtypeStruct((N, C), jnp.float32),
        in_specs=[pl.BlockSpec((P, tm, C), lambda i: (0, 0, 0)),
                  pl.BlockSpec((tm, 1), lambda i: (0, 0))],
        out_specs=pl.BlockSpec((tm, C), lambda i: (0, 0)),
        compiler_params=_cparams(1),
    )(p, rcp)
    return out                                   # (N, C) f32


@jax.jit
def linear(x, w, b):
    return _matmul_bias_act(x.astype(jnp.bfloat16), w, b, False, jnp.float32)


def basic_conv(x, p, stride=1, pad=(0, 0)):
    kh, kw = int(p['w'].shape[0]), int(p['w'].shape[1])
    if kh == 1 and kw == 1 and stride == 1 and pad == (0, 0):
        return conv1x1(x, p['w'], p['b'], relu=p['relu'])
    if stride == 1:
        return conv_spatial_s1(x, p['w'], p['b'], pad=pad, relu=p['relu'])
    return conv_im2col(x, p['w'], p['b'], stride=stride, pad=pad,
                       relu=p['relu'])


# --------------------------- parameter construction ---------------------------

class KeyGen:
    def __init__(self, seed):
        self.key = jax.random.PRNGKey(seed)

    def __call__(self):
        self.key, k = jax.random.split(self.key)
        return k


def make_conv(kg, cin, cout, k, relu=True, bn=True):
    """BasicConv2d (conv + folded eval-mode BatchNorm + relu) or biased conv."""
    if isinstance(k, int):
        k = (k, k)
    kh, kw = k
    fan_in = kh * kw * cin
    w = jax.random.normal(kg(), (kh, kw, cin, cout), jnp.float32) / math.sqrt(fan_in)
    if bn:
        gamma = 1.0 + 0.1 * jax.random.normal(kg(), (cout,), jnp.float32)
        beta = 0.1 * jax.random.normal(kg(), (cout,), jnp.float32)
        mean = 0.1 * jax.random.normal(kg(), (cout,), jnp.float32)
        var = 1.0 + 0.1 * jax.random.uniform(kg(), (cout,), jnp.float32)
        s = gamma / jnp.sqrt(var + BN_EPS)
        w = w * s
        b = beta - mean * s
    else:
        b = 0.01 * jax.random.normal(kg(), (cout,), jnp.float32)
    return {'w': w.astype(jnp.bfloat16), 'b': b.astype(jnp.float32),
            'relu': relu}


def fuse_1x1(convs):
    """Concatenate several same-input 1x1 convs along the output channel dim."""
    w = jnp.concatenate([c['w'] for c in convs], axis=-1)
    b = jnp.concatenate([c['b'] for c in convs], axis=0)
    sizes = tuple(int(c['w'].shape[-1]) for c in convs)
    return {'w': w, 'b': b, 'relu': True}, sizes


def make_block35(kg):
    head, sizes = fuse_1x1([make_conv(kg, 320, 32, 1),
                            make_conv(kg, 320, 32, 1),
                            make_conv(kg, 320, 32, 1)])
    up = make_conv(kg, 128, 320, 1, relu=False, bn=False)
    return {'head': head, 'head_sizes': sizes,
            'b1_1': make_conv(kg, 32, 32, 3),
            'b2_1': make_conv(kg, 32, 48, 3),
            'b2_2': make_conv(kg, 48, 64, 3),
            'up_w': up['w'].reshape(128, 320), 'up_b': up['b']}


def make_block17(kg):
    head, sizes = fuse_1x1([make_conv(kg, 1088, 192, 1),
                            make_conv(kg, 1088, 128, 1)])
    up = make_conv(kg, 384, 1088, 1, relu=False, bn=False)
    return {'head': head, 'head_sizes': sizes,
            'b1_1': make_conv(kg, 128, 160, (1, 7)),
            'b1_2': make_conv(kg, 160, 192, (7, 1)),
            'up_w': up['w'].reshape(384, 1088), 'up_b': up['b']}


def make_block8(kg):
    head, sizes = fuse_1x1([make_conv(kg, 2080, 192, 1),
                            make_conv(kg, 2080, 192, 1)])
    up = make_conv(kg, 448, 2080, 1, relu=False, bn=False)
    return {'head': head, 'head_sizes': sizes,
            'b1_1': make_conv(kg, 192, 224, (1, 3)),
            'b1_2': make_conv(kg, 224, 256, (3, 1)),
            'up_w': up['w'].reshape(448, 2080), 'up_b': up['b']}


def build_params(seed, num_classes):
    kg = KeyGen(seed)
    P = {}
    P['conv2d_1a'] = make_conv(kg, 3, 32, 3)
    P['conv2d_2a'] = make_conv(kg, 32, 32, 3)
    P['conv2d_2b'] = make_conv(kg, 32, 64, 3)
    P['conv2d_3b'] = make_conv(kg, 64, 80, 1)
    P['conv2d_4a'] = make_conv(kg, 80, 192, 3)

    head, sizes = fuse_1x1([make_conv(kg, 192, 96, 1),
                            make_conv(kg, 192, 48, 1),
                            make_conv(kg, 192, 64, 1)])
    P['mixed_5b'] = {'head': head, 'head_sizes': sizes,
                     'b1_1': make_conv(kg, 48, 64, 5),
                     'b2_1': make_conv(kg, 64, 96, 3),
                     'b2_2': make_conv(kg, 96, 96, 3),
                     'b3_1': make_conv(kg, 192, 64, 1)}
    P['block35'] = [make_block35(kg) for _ in range(NUM_BLOCK35)]
    P['mixed_6a'] = {'b0': make_conv(kg, 320, 384, 3),
                     'b1_0': make_conv(kg, 320, 256, 1),
                     'b1_1': make_conv(kg, 256, 256, 3),
                     'b1_2': make_conv(kg, 256, 384, 3)}
    P['block17'] = [make_block17(kg) for _ in range(NUM_BLOCK17)]
    head, sizes = fuse_1x1([make_conv(kg, 1088, 256, 1),
                            make_conv(kg, 1088, 256, 1),
                            make_conv(kg, 1088, 256, 1)])
    P['mixed_7a'] = {'head': head, 'head_sizes': sizes,
                     'b0_1': make_conv(kg, 256, 384, 3),
                     'b1_1': make_conv(kg, 256, 288, 3),
                     'b2_1': make_conv(kg, 256, 288, 3),
                     'b2_2': make_conv(kg, 288, 320, 3)}
    P['block8'] = [make_block8(kg) for _ in range(NUM_BLOCK8)]
    P['block8_final'] = make_block8(kg)
    P['conv2d_7b'] = make_conv(kg, 2080, 1536, 1)
    P['classif_w'] = (0.02 * jax.random.normal(kg(), (1536, num_classes),
                                               jnp.float32)).astype(jnp.bfloat16)
    P['classif_b'] = jnp.zeros((num_classes,), jnp.float32)
    return P


# --------------------------- forward pass -------------------------------------

def mixed_5b(x, p):
    h = basic_conv(x, p['head'])
    s0, s1, _ = p['head_sizes']
    x0 = h[..., :s0]
    x1 = basic_conv(h[..., s0:s0 + s1], p['b1_1'], pad=(2, 2))
    x2 = basic_conv(h[..., s0 + s1:], p['b2_1'], pad=(1, 1))
    x2 = basic_conv(x2, p['b2_2'], pad=(1, 1))
    x3 = basic_conv(avg_pool_3x3_s1_p1(x), p['b3_1'])
    return jnp.concatenate([x0, x1, x2, x3], axis=-1)


def block35(x, p, scale):
    h = basic_conv(x, p['head'])
    s0, s1, _ = p['head_sizes']
    h0 = h[..., :s0]
    x1 = basic_conv(h[..., s0:s0 + s1], p['b1_1'], pad=(1, 1))
    x2 = basic_conv(h[..., s0 + s1:], p['b2_1'], pad=(1, 1))
    x2 = basic_conv(x2, p['b2_2'], pad=(1, 1))
    return fused_up_residual(x, p['up_w'], p['up_b'], h0, x1, x2,
                             scale=scale, relu=True)


def mixed_6a(x, p):
    x0 = basic_conv(x, p['b0'], stride=2)
    x1 = basic_conv(x, p['b1_0'])
    x1 = basic_conv(x1, p['b1_1'], pad=(1, 1))
    x1 = basic_conv(x1, p['b1_2'], stride=2)
    x2 = max_pool(x, k=3, stride=2)
    return jnp.concatenate([x0, x1, x2], axis=-1)


def block17(x, p, scale):
    h = basic_conv(x, p['head'])
    s0, _ = p['head_sizes']
    h0 = h[..., :s0]
    x1 = basic_conv(h[..., s0:], p['b1_1'], pad=(0, 3))
    x1 = basic_conv(x1, p['b1_2'], pad=(3, 0))
    return fused_up_residual(x, p['up_w'], p['up_b'], h0, x1,
                             scale=scale, relu=True)


def mixed_7a(x, p):
    h = basic_conv(x, p['head'])
    s0, s1, _ = p['head_sizes']
    x0 = basic_conv(h[..., :s0], p['b0_1'], stride=2)
    x1 = basic_conv(h[..., s0:s0 + s1], p['b1_1'], stride=2)
    x2 = basic_conv(h[..., s0 + s1:], p['b2_1'], pad=(1, 1))
    x2 = basic_conv(x2, p['b2_2'], stride=2)
    x3 = max_pool(x, k=3, stride=2)
    return jnp.concatenate([x0, x1, x2, x3], axis=-1)


def block8(x, p, scale, relu):
    h = basic_conv(x, p['head'])
    s0, _ = p['head_sizes']
    h0 = h[..., :s0]
    x1 = basic_conv(h[..., s0:], p['b1_1'], pad=(0, 1))
    x1 = basic_conv(x1, p['b1_2'], pad=(1, 0))
    return fused_up_residual(x, p['up_w'], p['up_b'], h0, x1,
                             scale=scale, relu=relu)


def forward(params, x_nchw):
    """x_nchw: (N, 3, H, W) float32 -> logits (N, num_classes)."""
    x = jnp.transpose(x_nchw, (0, 2, 3, 1)).astype(jnp.bfloat16)  # NHWC bf16
    x = basic_conv(x, params['conv2d_1a'], stride=2)
    x = basic_conv(x, params['conv2d_2a'])
    x = basic_conv(x, params['conv2d_2b'], pad=(1, 1))
    x = max_pool(x, k=3, stride=2)
    x = basic_conv(x, params['conv2d_3b'])
    x = basic_conv(x, params['conv2d_4a'])
    x = max_pool(x, k=3, stride=2)
    x = mixed_5b(x, params['mixed_5b'])
    for p in params['block35']:
        x = block35(x, p, scale=0.17)
    x = mixed_6a(x, params['mixed_6a'])
    for p in params['block17']:
        x = block17(x, p, scale=0.10)
    x = mixed_7a(x, params['mixed_7a'])
    for p in params['block8']:
        x = block8(x, p, scale=0.20, relu=True)
    x = block8(x, params['block8_final'], scale=1.0, relu=False)  # no_relu=True
    x = basic_conv(x, params['conv2d_7b'])
    feat = global_avg_pool(x)                                     # (N, 1536) f32
    logits = linear(feat, params['classif_w'], params['classif_b'])
    return logits


if __name__ == "__main__":
    # dataset='imagenette' -> classif replaced with Linear(1536, 10)
    NUM_CLASSES = 10
    params = build_params(0, NUM_CLASSES)

    key = jax.random.PRNGKey(0)
    # PyTorch-convention NCHW input; 80x80 is a small spatial size that still
    # clears the Inception-ResNet-v2 stem (minimum is 75).
    x = jax.random.normal(key, (2, 3, 80, 80), jnp.float32)

    logits = forward(params, x)
    logits = jax.block_until_ready(logits)

    assert logits.shape == (2, NUM_CLASSES), logits.shape
    assert bool(jnp.all(jnp.isfinite(logits)))
    print("KERNEL_OK")
</pallas_src>

<mosaic_0001>
module attributes {stable_mosaic.version = 11 : i64} {
  func.func @_mm_bias_act_kernel(%arg0: i32, %arg1: memref<256x27xbf16, #tpu.memory_space<vmem>>, %arg2: memref<27x32xbf16, #tpu.memory_space<vmem>>, %arg3: memref<1x32xf32, #tpu.memory_space<vmem>>, %arg4: memref<256x32xbf16, #tpu.memory_space<vmem>>) attributes {dimension_semantics = [#tpu.dimension_semantics<parallel>], iteration_bounds = array<i64: 12>, scalar_prefetch = 0 : i64, scratch_operands = 0 : i64, tpu.core_type = #tpu.core_type<tc>, window_params = [{transform_indices = @transform_0, window_bounds = array<i64: 256, 27>}, {pipeline_mode = #tpu.pipeline_mode<synchronous>, transform_indices = @transform_1, window_bounds = array<i64: 27, 32>}, {pipeline_mode = #tpu.pipeline_mode<synchronous>, transform_indices = @transform_2, window_bounds = array<i64: 1, 32>}, {transform_indices = @transform_3, window_bounds = array<i64: 256, 32>}]} {
    %c0 = arith.constant 0 : index
    %c0_0 = arith.constant 0 : index
    %0 = vector.load %arg1[%c0, %c0_0] : memref<256x27xbf16, #tpu.memory_space<vmem>>, vector<256x27xbf16>
    %c0_1 = arith.constant 0 : index
    %c0_2 = arith.constant 0 : index
    %1 = vector.load %arg2[%c0_1, %c0_2] : memref<27x32xbf16, #tpu.memory_space<vmem>>, vector<27x32xbf16>
    %cst = arith.constant dense<0.000000e+00> : vector<256x32xf32>
    %2 = tpu.matmul %0, %1, %cst {dimension_numbers = #tpu.dot_dimension_numbers<[1], [0], [0], [1], [0, 0, 1, 1], [], []>} : vector<256x27xbf16>, vector<27x32xbf16>, vector<256x32xf32> -> vector<256x32xf32>
    %c0_3 = arith.constant 0 : index
    %c0_4 = arith.constant 0 : index
    %3 = vector.load %arg3[%c0_3, %c0_4] : memref<1x32xf32, #tpu.memory_space<vmem>>, vector<1x32xf32>
    %4 = vector.broadcast %3 : vector<1x32xf32> to vector<256x32xf32>
    %5 = arith.addf %2, %4 : vector<256x32xf32>
    %cst_5 = arith.constant 0.000000e+00 : f32
    %6 = vector.broadcast %cst_5 : f32 to vector<256x32xf32>
    %7 = arith.maximumf %5, %6 : vector<256x32xf32>
    %8 = arith.truncf %7 : vector<256x32xf32> to vector<256x32xbf16>
    %c0_6 = arith.constant 0 : index
    %c0_7 = arith.constant 0 : index
    %9 = vector.load %arg4[%c0_6, %c0_7] : memref<256x32xbf16, #tpu.memory_space<vmem>>, vector<256x32xbf16>
    tpu.vector_store %arg4[%c0_6, %c0_7], %8 {strides = array<i32>} : memref<256x32xbf16, #tpu.memory_space<vmem>>, vector<256x32xbf16>,
    return
  }
  func.func @transform_0(%arg0: i32) -> (i32, i32) {
    %c0_i32 = arith.constant 0 : i32
    %c0_i32_0 = arith.constant 0 : i32
    return %arg0, %c0_i32 : i32, i32
  }
  func.func @transform_1(%arg0: i32) -> (i32, i32) {
    %c0_i32 = arith.constant 0 : i32
    %c0_i32_0 = arith.constant 0 : i32
    %c0_i32_1 = arith.constant 0 : i32
    return %c0_i32, %c0_i32_0 : i32, i32
  }
  func.func @transform_2(%arg0: i32) -> (i32, i32) {
    %c0_i32 = arith.constant 0 : i32
    %c0_i32_0 = arith.constant 0 : i32
    %c0_i32_1 = arith.constant 0 : i32
    return %c0_i32, %c0_i32_0 : i32, i32
  }
  func.func @transform_3(%arg0: i32) -> (i32, i32) {
    %c0_i32 = arith.constant 0 : i32
    %c0_i32_0 = arith.constant 0 : i32
    return %arg0, %c0_i32 : i32, i32
  }
}

</mosaic_0001>

<bundles_post_ra>
// kernel: conv_im2col.1
= control target key start
LH: loop header
LB: loop body
LE: loop exit
PB: predicated region body
PF: predicated region fallthrough
CT: control target
= control target key end

     0   :  { %s1475_s12 = smov 0   ;;  %s1477_s13 = smov 0   ;;  %s1791_s0 = inlined_call_operand.vmem [shape: bf16[3042,27], index: 0, kind: input, shape index: {}]   ;;  %s1792_s1 = inlined_call_operand.vmem [shape: bf16[27,32], index: 1, kind: input, shape index: {}]   ;;  %s1793_s2 = inlined_call_operand.vmem [shape: f32[1,32], index: 2, kind: input, shape index: {}]   ;;  %s1794_s3 = inlined_call_operand.vmem [shape: bf16[3042,32], index: 3, kind: output, shape index: {}]  }
   0x1   :  { %s1479_s14 = smov 0  }
   0x2 LB: > { %s1488_s15 = sadd.s32 4294967295, %s1420_s14   ;;  %s1490_s16 = sadd.s32 1, %s1420_s14   ;;  %s1420_s14 = sphi %s1479_s14, %s1801_s14   ;;  %s1416_s13 = sphi %s1477_s13, %s1800_s13   ;;  %s1412_s12 = sphi %s1475_s12, %s1799_s12  }
   0x3   : > { %s85_s17 = ssub.s32 %s1420_s14, %s1490_s16  ;;  %s88_s18 = sadd.s32 1, %s1416_s13 }
   0x4   : > { %p86_p0 = scmp.eq.s32.totalorder %s85_s17, 0  ;;  %p98_p1 = scmp.ne.s32.totalorder %s1416_s13, %s1412_s12 }
   0x5   : > { %p99_p2 = scmp.eq.s32.totalorder %s1488_s15, 11  ;;  %p1078_p3 = scmp.ge.s32.totalorder %s1420_s14, 1 }
   0x6   : > { %s1498_s19 = scalar_select %p86_p0, %s1416_s13, %s88_s18  }
   0x7   : > { %p1500_p4 = por %p99_p2, %p98_p1  ;;  %p146_p5 = scmp.lt.s32.totalorder %s1420_s14, 13 }
   0x9   : > { %p147_p6 = pnand %p1078_p3, %p146_p5 }
   0xa   : > { %v1348_v0 = vld [vmem:[%s1792_s1] sm:$0xff] (!%p147_p6)   ;;  %vm376_vm0 = vcmask (!%p147_p6), 1044480   ;;  %v1349_v1 = vld [vmem:[%s1792_s1 + $0x8] sm:$0x3f] (!%p147_p6)   ;;  %vm377_vm1 = vcmask (!%p147_p6), 1045504   ;;  %s1511_s25 = sshll.u32 (!%p147_p6), %s1488_s15, 5 }
   0xb   : > { %150 = sbr.rel (%p147_p6) target bundleno = 341 (0x155), region = 32  ;;  %1219 = vmatprep.subr.bf16.mxu0 (!%p147_p6), %v1348_v0  ;;  %1255 = vmatprep.subr.bf16.mxu1 (!%p147_p6), %v1348_v0  ;;  %v1454_v2 = vmov (!%p147_p6), 65535   ;;  %p178_p7 = scmp.lt.s32.totalorder (!%p147_p6), %s1511_s25, 380  ;;  %vm327_vm2 = vcmask (!%p147_p6), 220160   ;;  %v1556_v22 = vld [vmem:[%s1793_s2] ss:$0 sm:$0xff] (!%p147_p6) }
   0xc   : > { %1220 = vmatpush3.bf16.msra.mxu0 (!%p147_p6), %v1348_v0  ;;  %1257 = vmatpush3.bf16.msra.mxu1 (!%p147_p6), %v1348_v0  ;;  %v378_v3 = vsel (!%p147_p6), %vm376_vm0, 4294967295, %v1454_v2  ;;  %s170_s4 = sand.u32 (!%p147_p6), 1, %s1412_s12   ;;  %vm704_vm3 = vcmask (!%p147_p6), 257024  }
   0xd   : > { %v379_v4 = vsel (!%p147_p6), %vm377_vm1, %v378_v3, 0  ;;  %s1079_s7 = sshll.u32 (!%p147_p6), %s170_s4, 7 }
   0xe   : > { %v381_v5 = vand.u32 (!%p147_p6), %v1349_v1, %v379_v4  ;;  %s1566_s8 = scalar_lea.vmem (!%p147_p6), [#allocation2], %s1079_s7  }
  0x10   : > { %1221 = vmatprep.subr.bf16.mxu0 (!%p147_p6), %v381_v5  ;;  %1256 = vmatprep.subr.bf16.mxu1 (!%p147_p6), %v381_v5 }
  0x11   : > { %1222 = vmatpush3.bf16.msra.mxu0 (!%p147_p6), %v381_v5  ;;  %1258 = vmatpush3.bf16.msra.mxu1 (!%p147_p6), %v381_v5 }
  0x12   : > { %s179_s26 = scalar_select %p178_p7, %s1511_s25, 380 }
  0x13   : > { %s745_s9 = ssub.s32 (%p1500_p4), 381, %s1511_s25  ;;  %s1198_s10 = sshll.u32 (%p1500_p4), %s1488_s15, 7 }
  0x14   : > { %s1081_s27 = sshll.u32 %s179_s26, 2  ;;  %p746_p8 = scmp.lt.s32.totalorder (%p1500_p4), %s745_s9, 32 }
  0x15   : > { %s1518_s30 = scalar_lea.vmem %s1791_s0, %s1081_s27  ;;  %s1663_s14 = scalar_lea.vmem (%p1500_p4), %s1794_s3, %s1198_s10  }
  0x16   : > { %v1350_v6 = vld [vmem:[%s1518_s30] sm:$0xff]   ;;  %v1352_v8 = vld [vmem:[%s1518_s30 + $0x8] sm:$0xff]   ;;  %v1354_v10 = vld [vmem:[%s1518_s30 + $0x10] sm:$0xff]  }
  0x17   : > { %v1351_v7 = vld [vmem:[%s1518_s30 + $0x40] sm:$0xff]   ;;  %1223 = vmatprep.mubr.msk.bf16.mxu0 %vm327_vm2, %v1350_v6  ;;  %v1353_v9 = vld [vmem:[%s1518_s30 + $0x48] sm:$0xff]   ;;  %v1355_v11 = vld [vmem:[%s1518_s30 + $0x50] sm:$0xff]  }
  0x18   : > { %1239 = vmatprep.mubr.msk.bf16.mxu1 %vm327_vm2, %v1351_v7  ;;  %1224 = vmatmul.mubr.msk.bf16.vlgmr.msra.gmra.mrb[0].mxu0 %vm327_vm2, %v1352_v8  ;;  %v1356_v12 = vld [vmem:[%s1518_s30 + $0x18] sm:$0xff]   ;;  %v1358_v14 = vld [vmem:[%s1518_s30 + $0x20] sm:$0xff]   ;;  %v1360_v16 = vld [vmem:[%s1518_s30 + $0x28] sm:$0xff]  }
  0x19   : > { %1240 = vmatmul.mubr.msk.bf16.vlgmr.msra.gmra.mrb[0].mxu1 %vm327_vm2, %v1353_v9  ;;  %1227 = vmatprep.mubr.msk.bf16.mxu0 %vm327_vm2, %v1354_v10  ;;  %v1357_v13 = vld [vmem:[%s1518_s30 + $0x58] sm:$0xff]   ;;  %v1359_v15 = vld [vmem:[%s1518_s30 + $0x60] sm:$0xff]   ;;  %v1361_v17 = vld [vmem:[%s1518_s30 + $0x68] sm:$0xff]  }
  0x1a   : > { %1243 = vmatprep.mubr.msk.bf16.mxu1 %vm327_vm2, %v1355_v11  ;;  %v1362_v18 = vld [vmem:[%s1518_s30 + $0x30] sm:$0xff]   ;;  %v1364_v20 = vld [vmem:[%s1518_s30 + $0x38] sm:$0xff]  }
  0x1b   : > { %v1363_v19 = vld [vmem:[%s1518_s30 + $0x70] sm:$0xff]   ;;  %v1365_v21 = vld [vmem:[%s1518_s30 + $0x78] sm:$0xff]  }
  0x20   : > { %1228 = vmatmul.mubr.msk.bf16.gmra.mrb[4].mxu0 %vm327_vm2, %v1356_v12 }
  0x21   : > { %1244 = vmatmul.mubr.msk.bf16.gmra.mrb[4].mxu1 %vm327_vm2, %v1357_v13  ;;  %1231 = vmatprep.mubr.msk.bf16.mxu0 %vm327_vm2, %v1358_v14 }
  0x22   : > { %1247 = vmatprep.mubr.msk.bf16.mxu1 %vm327_vm2, %v1359_v15 }
  0x28   : > { %1232 = vmatmul.mubr.msk.bf16.gmra.mrb[8].mxu0 %vm327_vm2, %v1360_v16 }
  0x29   : > { %1248 = vmatmul.mubr.msk.bf16.gmra.mrb[8].mxu1 %vm327_vm2, %v1361_v17  ;;  %1235 = vmatprep.mubr.msk.bf16.mxu0 %vm327_vm2, %v1362_v18 }
  0x2a   : > { %1251 = vmatprep.mubr.msk.bf16.mxu1 %vm327_vm2, %v1363_v19 }
  0x30   : > { %1236 = vmatmul.mubr.msk.bf16.gmra.mrb[12].mxu0 %vm327_vm2, %v1364_v20 }
  0x31   : > { %1252 = vmatmul.mubr.msk.bf16.gmra.mrb[12].mxu1 %vm327_vm2, %v1365_v21 }
  0xeb   : > { %v1225_v23 = vpop.f32.mrb[0].mxu0 }
  0xec   : > { %v426_v24 = vadd.f32 %v1225_v23, %v1556_v22  ;;  %v1241_v25 = vpop.f32.mrb[0].mxu1  ;;  %v417_v26 = vpop.f32.mrb[1].mxu0 }
  0xed   : > { %v490_v27 = vadd.f32 %v1241_v25, %v1556_v22  ;;  %v418_v28 = vadd.f32 %v1556_v22, %v417_v26  ;;  %v481_v29 = vpop.f32.mrb[1].mxu1  ;;  %v1226_v30 = vpop.f32.mrb[2].mxu0 }
  0xee   : > { %v546_v31 = vmax.f32 %v426_v24, 0.0  ;;  %v482_v32 = vadd.f32 %v1556_v22, %v481_v29  ;;  %v429_v33 = vadd.f32 %v1226_v30, %v1556_v22  ;;  %v1242_v34 = vpop.f32.mrb[2].mxu1  ;;  %v420_v35 = vpop.f32.mrb[3].mxu0 }
  0xef   : > { %v562_v36 = vmax.f32 %v490_v27, 0.0  ;;  %v544_v37 = vmax.f32 %v418_v28, 0.0  ;;  %v493_v38 = vadd.f32 %v1242_v34, %v1556_v22  ;;  %v421_v39 = vadd.f32 %v1556_v22, %v420_v35  ;;  %v484_v40 = vpop.f32.mrb[3].mxu1 }
  0xf0   : > { %v1168_v41 = vpack.c.bf16 %v546_v31, %v546_v31  ;;  %v560_v42 = vmax.f32 %v482_v32, 0.0  ;;  %v547_v43 = vmax.f32 %v429_v33, 0.0  ;;  %v485_v44 = vadd.f32 %v1556_v22, %v484_v40 }
  0xf1   : > { %v1184_v45 = vpack.c.bf16 %v562_v36, %v562_v36  ;;  %v1166_v46 = vpack.c.bf16 %v544_v37, %v544_v37  ;;  %v563_v47 = vmax.f32 %v493_v38, 0.0  ;;  %v545_v48 = vmax.f32 %v421_v39, 0.0 }
  0xf2   : > { %707 = vst.msk [vmem:[%s1566_s8 + $0x8] sm:$0xf] %vm704_vm3, %v1168_v41  ;;  %v1182_v49 = vpack.c.bf16 %v560_v42, %v560_v42  ;;  %v1169_v50 = vpack.c.bf16 %v547_v43, %v547_v43  ;;  %v561_v51 = vmax.f32 %v485_v44, 0.0 }
  0xf3   : > { %723 = vst.msk [vmem:[%s1566_s8 + $0x48] sm:$0xf] %vm704_vm3, %v1184_v45  ;;  %705 = vst.msk [vmem:[%s1566_s8] sm:$0xf] %vm704_vm3, %v1166_v46  ;;  %v1185_v52 = vpack.c.bf16 %v563_v47, %v563_v47  ;;  %v1167_v53 = vpack.c.bf16 %v545_v48, %v545_v48  ;;  %v1229_v54 = vpop.f32.mrb[4].mxu0 }
  0xf4   : > { %721 = vst.msk [vmem:[%s1566_s8 + $0x40] sm:$0xf] %vm704_vm3, %v1182_v49  ;;  %708 = vst.msk [vmem:[%s1566_s8 + $0xc] sm:$0xf] %vm704_vm3, %v1169_v50  ;;  %v1183_v55 = vpack.c.bf16 %v561_v51, %v561_v51  ;;  %v442_v56 = vadd.f32 %v1229_v54, %v1556_v22  ;;  %v1245_v57 = vpop.f32.mrb[4].mxu1  ;;  %v433_v58 = vpop.f32.mrb[5].mxu0 }
  0xf5   : > { %724 = vst.msk [vmem:[%s1566_s8 + $0x4c] sm:$0xf] %vm704_vm3, %v1185_v52  ;;  %706 = vst.msk [vmem:[%s1566_s8 + $0x4] sm:$0xf] %vm704_vm3, %v1167_v53  ;;  %v506_v59 = vadd.f32 %v1245_v57, %v1556_v22  ;;  %v434_v60 = vadd.f32 %v1556_v22, %v433_v58  ;;  %v497_v61 = vpop.f32.mrb[5].mxu1  ;;  %v1230_v62 = vpop.f32.mrb[6].mxu0 }
  0xf6   : > { %722 = vst.msk [vmem:[%s1566_s8 + $0x44] sm:$0xf] %vm704_vm3, %v1183_v55  ;;  %v550_v63 = vmax.f32 %v442_v56, 0.0  ;;  %v498_v0 = vadd.f32 %v1556_v22, %v497_v61  ;;  %v445_v1 = vadd.f32 %v1230_v62, %v1556_v22  ;;  %v1246_v2 = vpop.f32.mrb[6].mxu1  ;;  %v436_v3 = vpop.f32.mrb[7].mxu0 }
  0xf7   : > { %v566_v4 = vmax.f32 %v506_v59, 0.0  ;;  %v548_v5 = vmax.f32 %v434_v60, 0.0  ;;  %v509_v6 = vadd.f32 %v1246_v2, %v1556_v22  ;;  %v437_v7 = vadd.f32 %v1556_v22, %v436_v3  ;;  %v500_v8 = vpop.f32.mrb[7].mxu1 }
  0xf8   : > { %v1172_v9 = vpack.c.bf16 %v550_v63, %v550_v63  ;;  %v564_v10 = vmax.f32 %v498_v0, 0.0  ;;  %v551_v11 = vmax.f32 %v445_v1, 0.0  ;;  %v501_v12 = vadd.f32 %v1556_v22, %v500_v8 }
  0xf9   : > { %v1188_v13 = vpack.c.bf16 %v566_v4, %v566_v4  ;;  %v1170_v14 = vpack.c.bf16 %v548_v5, %v548_v5  ;;  %v567_v15 = vmax.f32 %v509_v6, 0.0  ;;  %v549_v16 = vmax.f32 %v437_v7, 0.0 }
  0xfa   : > { %711 = vst.msk [vmem:[%s1566_s8 + $0x18] sm:$0xf] %vm704_vm3, %v1172_v9  ;;  %v1186_v17 = vpack.c.bf16 %v564_v10, %v564_v10  ;;  %v1173_v18 = vpack.c.bf16 %v551_v11, %v551_v11  ;;  %v565_v19 = vmax.f32 %v501_v12, 0.0 }
  0xfb   : > { %727 = vst.msk [vmem:[%s1566_s8 + $0x58] sm:$0xf] %vm704_vm3, %v1188_v13  ;;  %709 = vst.msk [vmem:[%s1566_s8 + $0x10] sm:$0xf] %vm704_vm3, %v1170_v14  ;;  %v1189_v20 = vpack.c.bf16 %v567_v15, %v567_v15  ;;  %v1171_v21 = vpack.c.bf16 %v549_v16, %v549_v16  ;;  %v1233_v23 = vpop.f32.mrb[8].mxu0 }
  0xfc   : > { %725 = vst.msk [vmem:[%s1566_s8 + $0x50] sm:$0xf] %vm704_vm3, %v1186_v17  ;;  %712 = vst.msk [vmem:[%s1566_s8 + $0x1c] sm:$0xf] %vm704_vm3, %v1173_v18  ;;  %v1187_v24 = vpack.c.bf16 %v565_v19, %v565_v19  ;;  %v458_v25 = vadd.f32 %v1233_v23, %v1556_v22  ;;  %v1249_v26 = vpop.f32.mrb[8].mxu1  ;;  %v449_v27 = vpop.f32.mrb[9].mxu0 }
  0xfd   : > { %728 = vst.msk [vmem:[%s1566_s8 + $0x5c] sm:$0xf] %vm704_vm3, %v1189_v20  ;;  %710 = vst.msk [vmem:[%s1566_s8 + $0x14] sm:$0xf] %vm704_vm3, %v1171_v21  ;;  %v522_v28 = vadd.f32 %v1249_v26, %v1556_v22  ;;  %v450_v29 = vadd.f32 %v1556_v22, %v449_v27  ;;  %v513_v30 = vpop.f32.mrb[9].mxu1  ;;  %v1234_v31 = vpop.f32.mrb[10].mxu0 }
  0xfe   : > { %726 = vst.msk [vmem:[%s1566_s8 + $0x54] sm:$0xf] %vm704_vm3, %v1187_v24  ;;  %v554_v32 = vmax.f32 %v458_v25, 0.0  ;;  %v514_v33 = vadd.f32 %v1556_v22, %v513_v30  ;;  %v461_v34 = vadd.f32 %v1234_v31, %v1556_v22  ;;  %v1250_v35 = vpop.f32.mrb[10].mxu1  ;;  %v452_v36 = vpop.f32.mrb[11].mxu0 }
  0xff   : > { %v570_v37 = vmax.f32 %v522_v28, 0.0  ;;  %v552_v38 = vmax.f32 %v450_v29, 0.0  ;;  %v525_v39 = vadd.f32 %v1250_v35, %v1556_v22  ;;  %v453_v40 = vadd.f32 %v1556_v22, %v452_v36  ;;  %v516_v41 = vpop.f32.mrb[11].mxu1 }
 0x100   : > { %v1176_v42 = vpack.c.bf16 %v554_v32, %v554_v32  ;;  %v568_v43 = vmax.f32 %v514_v33, 0.0  ;;  %v555_v44 = vmax.f32 %v461_v34, 0.0  ;;  %v517_v45 = vadd.f32 %v1556_v22, %v516_v41 }
 0x101   : > { %v1192_v46 = vpack.c.bf16 %v570_v37, %v570_v37  ;;  %v1174_v47 = vpack.c.bf16 %v552_v38, %v552_v38  ;;  %v571_v48 = vmax.f32 %v525_v39, 0.0  ;;  %v553_v49 = vmax.f32 %v453_v40, 0.0 }
 0x102   : > { %715 = vst.msk [vmem:[%s1566_s8 + $0x28] sm:$0xf] %vm704_vm3, %v1176_v42  ;;  %v1190_v50 = vpack.c.bf16 %v568_v43, %v568_v43  ;;  %v1177_v51 = vpack.c.bf16 %v555_v44, %v555_v44  ;;  %v569_v52 = vmax.f32 %v517_v45, 0.0 }
 0x103   : > { %731 = vst.msk [vmem:[%s1566_s8 + $0x68] sm:$0xf] %vm704_vm3, %v1192_v46  ;;  %713 = vst.msk [vmem:[%s1566_s8 + $0x20] sm:$0xf] %vm704_vm3, %v1174_v47  ;;  %v1193_v53 = vpack.c.bf16 %v571_v48, %v571_v48  ;;  %v1175_v54 = vpack.c.bf16 %v553_v49, %v553_v49  ;;  %v1237_v55 = vpop.f32.mrb[12].mxu0 }
 0x104   : > { %729 = vst.msk [vmem:[%s1566_s8 + $0x60] sm:$0xf] %vm704_vm3, %v1190_v50  ;;  %716 = vst.msk [vmem:[%s1566_s8 + $0x2c] sm:$0xf] %vm704_vm3, %v1177_v51  ;;  %v1191_v56 = vpack.c.bf16 %v569_v52, %v569_v52  ;;  %v474_v57 = vadd.f32 %v1237_v55, %v1556_v22  ;;  %v1253_v58 = vpop.f32.mrb[12].mxu1  ;;  %v465_v59 = vpop.f32.mrb[13].mxu0 }
 0x105   : > { %732 = vst.msk [vmem:[%s1566_s8 + $0x6c] sm:$0xf] %vm704_vm3, %v1193_v53  ;;  %714 = vst.msk [vmem:[%s1566_s8 + $0x24] sm:$0xf] %vm704_vm3, %v1175_v54  ;;  %v538_v60 = vadd.f32 %v1253_v58, %v1556_v22  ;;  %v466_v61 = vadd.f32 %v1556_v22, %v465_v59  ;;  %v529_v62 = vpop.f32.mrb[13].mxu1  ;;  %v1238_v63 = vpop.f32.mrb[14].mxu0 }
 0x106   : > { %730 = vst.msk [vmem:[%s1566_s8 + $0x64] sm:$0xf] %vm704_vm3, %v1191_v56  ;;  %v558_v0 = vmax.f32 %v474_v57, 0.0  ;;  %v530_v1 = vadd.f32 %v1556_v22, %v529_v62  ;;  %v477_v2 = vadd.f32 %v1238_v63, %v1556_v22  ;;  %v1254_v3 = vpop.f32.mrb[14].mxu1  ;;  %v468_v4 = vpop.f32.mrb[15].mxu0 }
 0x107   : > { %v574_v5 = vmax.f32 %v538_v60, 0.0  ;;  %v556_v6 = vmax.f32 %v466_v61, 0.0  ;;  %v541_v7 = vadd.f32 %v1254_v3, %v1556_v22  ;;  %v469_v8 = vadd.f32 %v1556_v22, %v468_v4  ;;  %v532_v9 = vpop.f32.mrb[15].mxu1 }
 0x108   : > { %v1180_v10 = vpack.c.bf16 %v558_v0, %v558_v0  ;;  %v572_v11 = vmax.f32 %v530_v1, 0.0  ;;  %v559_v12 = vmax.f32 %v477_v2, 0.0  ;;  %v533_v13 = vadd.f32 %v1556_v22, %v532_v9  ;;  %743 = sbr.rel (!%p1500_p4) target bundleno = 341 (0x155), region = 36 }
 0x109   : > { %v1196_v14 = vpack.c.bf16 %v574_v5, %v574_v5  ;;  %v1178_v15 = vpack.c.bf16 %v556_v6, %v556_v6  ;;  %v575_v16 = vmax.f32 %v541_v7, 0.0  ;;  %v557_v17 = vmax.f32 %v469_v8, 0.0 }
 0x10a   : > { %719 = vst.msk [vmem:[%s1566_s8 + $0x38] sm:$0xf] %vm704_vm3, %v1180_v10  ;;  %v1194_v18 = vpack.c.bf16 %v572_v11, %v572_v11  ;;  %v1181_v19 = vpack.c.bf16 %v559_v12, %v559_v12  ;;  %v573_v20 = vmax.f32 %v533_v13, 0.0 }
 0x10b   : > { %735 = vst.msk [vmem:[%s1566_s8 + $0x78] sm:$0xf] %vm704_vm3, %v1196_v14  ;;  %717 = vst.msk [vmem:[%s1566_s8 + $0x30] sm:$0xf] %vm704_vm3, %v1178_v15  ;;  %v1197_v21 = vpack.c.bf16 %v575_v16, %v575_v16  ;;  %v1179_v23 = vpack.c.bf16 %v557_v17, %v557_v17 }
 0x10c   : > { %733 = vst.msk [vmem:[%s1566_s8 + $0x70] sm:$0xf] %vm704_vm3, %v1194_v18  ;;  %720 = vst.msk [vmem:[%s1566_s8 + $0x3c] sm:$0xf] %vm704_vm3, %v1181_v19  ;;  %v1195_v22 = vpack.c.bf16 %v573_v20, %v573_v20 }
 0x10d   : > { %736 = vst.msk [vmem:[%s1566_s8 + $0x7c] sm:$0xf] %vm704_vm3, %v1197_v21  ;;  %718 = vst.msk [vmem:[%s1566_s8 + $0x34] sm:$0xf] %vm704_vm3, %v1179_v23 }
 0x10e   : > { %734 = vst.msk [vmem:[%s1566_s8 + $0x74] sm:$0xf] %vm704_vm3, %v1195_v22 }
 0x10f   : > { %s1803_s9 = smov (!%p746_p8, %s745_s9), 32 }
 0x110   : > { %s1151_s17 = sshll.u32 %s1803_s9, 6 }
 0x111   : > { %p1154_p9 = scmp.eq.s32.totalorder %s1151_s17, 0 }
 0x112   : > { %s1669_s18 = sshrl.u32 (!%p1154_p9), %s1803_s9, 5 }
 0x113   : > { %754 = sbr.rel (%p1154_p9) target bundleno = 341 (0x155), region = 40  ;;  %p1155_p10 = scmp.le.s32.totalorder (!%p1154_p9), %s1669_s18, 0 }
 0x11a   : > { %1031 = sbr.rel (%p1155_p10) target bundleno = 320 (0x140), region = 112  ;;  %s1796_s15 = smov (!%p1155_p10), %s1663_s14 }
 0x11b   : > { %s1797_s20 = smov (!%p1155_p10), %s1566_s8  ;;  %s1678_s21 = smov (!%p1155_p10), 0  }
 0x11c   : > { %s1680_s22 = smov (!%p1155_p10), 0  }
 0x121 LB: >> { %v770_v24 = vld [vmem:[%s1428_s20] sm:$0xf]  ;;  %v772_v25 = vld [vmem:[%s1428_s20 + $0x4] sm:$0xf]  ;;  %v774_v26 = vld [vmem:[%s1428_s20 + $0x8] sm:$0xf]  ;;  %s1436_s22 = sphi %s1680_s22, %s764_s22   ;;  %s1432_s21 = sphi %s1678_s21, %s1798_s21   ;;  %s1428_s20 = sphi %s1797_s20, %s839_s20   ;;  %s1424_s15 = sphi %s1796_s15, %s840_s15  }
 0x122   : >> { %771 = vst [vmem:[%s1424_s15] sm:$0xf] %v770_v24  ;;  %773 = vst [vmem:[%s1424_s15 + $0x4] sm:$0xf] %v772_v25  ;;  %v776_v27 = vld [vmem:[%s1428_s20 + $0xc] sm:$0xf]  ;;  %s834_s23 = sadd.s32 1, %s1432_s21 }
 0x123   : >> { %775 = vst [vmem:[%s1424_s15 + $0x8] sm:$0xf] %v774_v26  ;;  %v778_v28 = vld [vmem:[%s1428_s20 + $0x10] sm:$0xf]  ;;  %v780_v29 = vld [vmem:[%s1428_s20 + $0x14] sm:$0xf]  ;;  %p835_p11 = scmp.ge.s32.totalorder %s834_s23, %s1669_s18 }
 0x124   : >> { %777 = vst [vmem:[%s1424_s15 + $0xc] sm:$0xf] %v776_v27  ;;  %779 = vst [vmem:[%s1424_s15 + $0x10] sm:$0xf] %v778_v28  ;;  %v782_v30 = vld [vmem:[%s1428_s20 + $0x18] sm:$0xf] }
 0x125   : >> { %781 = vst [vmem:[%s1424_s15 + $0x14] sm:$0xf] %v780_v29  ;;  %v784_v31 = vld [vmem:[%s1428_s20 + $0x1c] sm:$0xf]  ;;  %v786_v32 = vld [vmem:[%s1428_s20 + $0x20] sm:$0xf] }
 0x126   : >> { %783 = vst [vmem:[%s1424_s15 + $0x18] sm:$0xf] %v782_v30  ;;  %785 = vst [vmem:[%s1424_s15 + $0x1c] sm:$0xf] %v784_v31  ;;  %v788_v33 = vld [vmem:[%s1428_s20 + $0x24] sm:$0xf] }
 0x127   : >> { %787 = vst [vmem:[%s1424_s15 + $0x20] sm:$0xf] %v786_v32  ;;  %v790_v34 = vld [vmem:[%s1428_s20 + $0x28] sm:$0xf]  ;;  %v792_v35 = vld [vmem:[%s1428_s20 + $0x2c] sm:$0xf] }
 0x128   : >> { %789 = vst [vmem:[%s1424_s15 + $0x24] sm:$0xf] %v788_v33  ;;  %791 = vst [vmem:[%s1424_s15 + $0x28] sm:$0xf] %v790_v34  ;;  %v794_v36 = vld [vmem:[%s1428_s20 + $0x30] sm:$0xf] }
 0x129   : >> { %793 = vst [vmem:[%s1424_s15 + $0x2c] sm:$0xf] %v792_v35  ;;  %v796_v37 = vld [vmem:[%s1428_s20 + $0x34] sm:$0xf]  ;;  %v798_v38 = vld [vmem:[%s1428_s20 + $0x38] sm:$0xf] }
 0x12a   : >> { %795 = vst [vmem:[%s1424_s15 + $0x30] sm:$0xf] %v794_v36  ;;  %797 = vst [vmem:[%s1424_s15 + $0x34] sm:$0xf] %v796_v37  ;;  %v800_v39 = vld [vmem:[%s1428_s20 + $0x3c] sm:$0xf] }
 0x12b   : >> { %799 = vst [vmem:[%s1424_s15 + $0x38] sm:$0xf] %v798_v38  ;;  %v802_v40 = vld [vmem:[%s1428_s20 + $0x40] sm:$0xf]  ;;  %v804_v41 = vld [vmem:[%s1428_s20 + $0x44] sm:$0xf] }
 0x12c   : >> { %801 = vst [vmem:[%s1424_s15 + $0x3c] sm:$0xf] %v800_v39  ;;  %803 = vst [vmem:[%s1424_s15 + $0x40] sm:$0xf] %v802_v40  ;;  %v806_v42 = vld [vmem:[%s1428_s20 + $0x48] sm:$0xf] }
 0x12d   : >> { %805 = vst [vmem:[%s1424_s15 + $0x44] sm:$0xf] %v804_v41  ;;  %v808_v43 = vld [vmem:[%s1428_s20 + $0x4c] sm:$0xf]  ;;  %v810_v44 = vld [vmem:[%s1428_s20 + $0x50] sm:$0xf] }
 0x12e   : >> { %807 = vst [vmem:[%s1424_s15 + $0x48] sm:$0xf] %v806_v42  ;;  %809 = vst [vmem:[%s1424_s15 + $0x4c] sm:$0xf] %v808_v43  ;;  %v812_v45 = vld [vmem:[%s1428_s20 + $0x54] sm:$0xf] }
 0x12f   : >> { %811 = vst [vmem:[%s1424_s15 + $0x50] sm:$0xf] %v810_v44  ;;  %v814_v46 = vld [vmem:[%s1428_s20 + $0x58] sm:$0xf]  ;;  %v816_v47 = vld [vmem:[%s1428_s20 + $0x5c] sm:$0xf] }
 0x130   : >> { %813 = vst [vmem:[%s1424_s15 + $0x54] sm:$0xf] %v812_v45  ;;  %815 = vst [vmem:[%s1424_s15 + $0x58] sm:$0xf] %v814_v46  ;;  %v818_v48 = vld [vmem:[%s1428_s20 + $0x60] sm:$0xf] }
 0x131   : >> { %817 = vst [vmem:[%s1424_s15 + $0x5c] sm:$0xf] %v816_v47  ;;  %v820_v49 = vld [vmem:[%s1428_s20 + $0x64] sm:$0xf]  ;;  %v822_v50 = vld [vmem:[%s1428_s20 + $0x68] sm:$0xf] }
 0x132   : >> { %819 = vst [vmem:[%s1424_s15 + $0x60] sm:$0xf] %v818_v48  ;;  %821 = vst [vmem:[%s1424_s15 + $0x64] sm:$0xf] %v820_v49  ;;  %v824_v51 = vld [vmem:[%s1428_s20 + $0x6c] sm:$0xf] }
 0x133   : >> { %823 = vst [vmem:[%s1424_s15 + $0x68] sm:$0xf] %v822_v50  ;;  %v826_v52 = vld [vmem:[%s1428_s20 + $0x70] sm:$0xf]  ;;  %v828_v53 = vld [vmem:[%s1428_s20 + $0x74] sm:$0xf] }
 0x134   : >> { %825 = vst [vmem:[%s1424_s15 + $0x6c] sm:$0xf] %v824_v51  ;;  %827 = vst [vmem:[%s1424_s15 + $0x70] sm:$0xf] %v826_v52  ;;  %v830_v54 = vld [vmem:[%s1428_s20 + $0x78] sm:$0xf] }
 0x135   : >> { %829 = vst [vmem:[%s1424_s15 + $0x74] sm:$0xf] %v828_v53  ;;  %v832_v55 = vld [vmem:[%s1428_s20 + $0x7c] sm:$0xf]  ;;  %831 = vst [vmem:[%s1424_s15 + $0x78] sm:$0xf] %v830_v54 }
 0x136   : >> { %833 = vst [vmem:[%s1424_s15 + $0x7c] sm:$0xf] %v832_v55  ;;  %s1805_s23 = smov (%p835_p11, %s834_s23), 0  ;;  %s764_s22 = sadd.s32 1, %s1436_s22  }
 0x137   : >> { %s1156_s24 = sshll.u32 %s1805_s23, 7  ;;  %p763_p12 = scmp.ge.s32.totalorder %s764_s22, %s1669_s18 }
 0x138   : >> { %s839_s20 = scalar_lea.vmem %s1566_s8, %s1156_s24 [#allocation2]   ;;  %s840_s15 = scalar_lea.vmem %s1663_s14, %s1156_s24  }
 0x139   : >> { %s1798_s21 = smov %s1805_s23  ;;  %766 = sbr.rel (!%p763_p12) target bundleno = 289 (0x121), region = 118 }
 0x140 PF: > { %s1773_s25 = sand.u32 31, %s1803_s9   ;;  %s1199_s26 = sshll.u32 %s1669_s18, 7 }
 0x141   : > { %s845_s27 = scalar_lea.vmem %s1566_s8, %s1199_s26 [#allocation2]   ;;  %s847_s28 = scalar_lea.vmem %s1663_s14, %s1199_s26  }
 0x142   : > { %p1161_p13 = scmp.le.s32.totalorder %s1773_s25, 0 }
 0x143   : > { %s1438_s29 = smov (!%p1161_p13), %s847_s28   ;;  %s1442_s30 = smov (!%p1161_p13), %s845_s27  }
 0x144   : > { %1045 = sbr.rel (%p1161_p13) target bundleno = 341 (0x155), region = 123  ;;  %s1446_s4 = smov (!%p1161_p13), 0  }
 0x145   : > { %s1450_s5 = smov (!%p1161_p13), 0  }
 0x14b LB: >> { %v857_v56 = vld [vmem:[%s1444_s30] sm:$0xf]  ;;  %s859_s6 = sadd.s32 1, %s1448_s4  ;;  %s851_s5 = sadd.s32 1, %s1452_s5   ;;  %s1452_s5 = sphi %s1450_s5, %s851_s5   ;;  %s1448_s4 = sphi %s1446_s4, %s1447_s4   ;;  %s1444_s30 = sphi %s1442_s30, %s864_s30   ;;  %s1440_s29 = sphi %s1438_s29, %s865_s29  }
 0x14c   : >> { %858 = vst [vmem:[%s1440_s29] sm:$0xf] %v857_v56  ;;  %p860_p0 = scmp.ge.s32.totalorder %s859_s6, %s1773_s25  ;;  %p850_p1 = scmp.ge.s32.totalorder %s851_s5, %s1773_s25 }
 0x14e   : >> { %s1807_s6 = smov (%p860_p0, %s859_s6), 0  ;;  %853 = sbr.rel (!%p850_p1) target bundleno = 331 (0x14b), region = 129 }
 0x14f   : >> { %s1162_s7 = sshll.u32 %s1807_s6, 2  ;;  %s1447_s4 = smov %s1807_s6  }
 0x150   : >> { %s864_s30 = scalar_lea.vmem %s845_s27, %s1162_s7 [#allocation2]   ;;  %s865_s29 = scalar_lea.vmem %s847_s28, %s1162_s7  }
 0x155 PF: > { %p10_p2 = scmp.ge.s32.totalorder %s1490_s16, 14   ;;  %s1799_s12 = smov %s1416_s13 }
 0x156   : > { %s1800_s13 = smov %s1498_s19  ;;  %s1801_s14 = smov %s1490_s16 }
 0x157   :  { %12 = sbr.rel (!%p10_p2) target bundleno = 2 (0x2), region = 140 }

</bundles_post_ra>
